<compile_context>
chip_gen: v7x
topology: tpu7x:2x2x1
jax: 0.10.0
libtpu: 0.0.40
codegen_flags: <defaults>
</compile_context>

<pallas_src>
import math
import jax
import jax.numpy as jnp
from jax.experimental import pallas as pl
from jax.experimental.pallas import tpu as pltpu


def _round_up(x, m):
    return ((x + m - 1) // m) * m


def _intermediate_kernel(x_ref, w_ref, b_ref, o_ref):
    # x_ref: (tm, H) [bf16/f32], w_ref: (H, tn) [bf16/f32], b_ref: (1, tn) f32,
    # o_ref: (tm, tn) output dtype.
    y = jnp.dot(x_ref[...], w_ref[...], preferred_element_type=jnp.float32)
    y = y + b_ref[...].astype(jnp.float32)
    # exact GELU: y * 0.5 * (1 + erf(y / sqrt(2))) -- matches torch.erf-based gelu
    inv_sqrt2 = jnp.float32(1.0 / math.sqrt(2.0))
    g = y * 0.5 * (1.0 + jax.lax.erf(y * inv_sqrt2))
    o_ref[...] = g.astype(o_ref.dtype)


def bert_intermediate(hidden_states, weight_t, bias, *, tm=256, tn=512,
                      compute_dtype=jnp.bfloat16):
    """hidden_states: [B, S, H]; weight_t: [H, N] (transposed nn.Linear weight);
    bias: [N]. Returns [B, S, N] in hidden_states.dtype.

    tm: row tile (rounded down to what M needs, always a multiple of 8).
    tn: intermediate-dim tile (multiple of 128); falls back to full N if N % tn != 0.
    compute_dtype: dtype fed to the MXU (bf16 recommended); accumulation is f32.
    """
    B, S, H = hidden_states.shape
    N = weight_t.shape[1]
    out_dtype = hidden_states.dtype
    M = B * S

    x2d = hidden_states.reshape(M, H)

    # Row tiling: pad M so it divides evenly into MXU-friendly tiles.
    tm_eff = min(tm, _round_up(M, 8))
    M_pad = _round_up(M, tm_eff)
    if M_pad != M:
        x2d = jnp.pad(x2d, ((0, M_pad - M), (0, 0)))

    # N tiling: keep lane-dense output tiles; fall back to the full dim if tn
    # does not divide N (small configs).
    tn_eff = tn if (N % tn == 0) else N

    # Cast matmul operands to the compute dtype outside the kernel so the
    # HBM->VMEM DMAs also shrink. Bias / epilogue stay in f32.
    if compute_dtype is not None and jnp.dtype(compute_dtype) != x2d.dtype:
        x2d = x2d.astype(compute_dtype)
        weight_t = weight_t.astype(compute_dtype)
    b2d = bias.reshape(1, N).astype(jnp.float32)

    # N-tile axis outermost so each weight slab is DMA'd once and reused across
    # all row tiles; row-tile axis innermost.
    grid = (N // tn_eff, M_pad // tm_eff)

    out = pl.pallas_call(
        _intermediate_kernel,
        out_shape=jax.ShapeDtypeStruct((M_pad, N), out_dtype),
        grid_spec=pltpu.PrefetchScalarGridSpec(
            num_scalar_prefetch=0,
            grid=grid,
            in_specs=[
                pl.BlockSpec((tm_eff, H), lambda j, i: (i, 0)),
                pl.BlockSpec((H, tn_eff), lambda j, i: (0, j)),
                pl.BlockSpec((1, tn_eff), lambda j, i: (0, j)),
            ],
            out_specs=pl.BlockSpec((tm_eff, tn_eff), lambda j, i: (i, j)),
        ),
        compiler_params=pltpu.CompilerParams(
            dimension_semantics=("parallel", "parallel"),
            vmem_limit_bytes=64 * 1024 * 1024,
        ),
    )(x2d, weight_t, b2d)

    if M_pad != M:
        out = out[:M]
    return out.reshape(B, S, N)


def _reference(hidden_states, weight_t, bias):
    y = jnp.einsum("bsh,hn->bsn", hidden_states, weight_t) + bias
    return y * 0.5 * (1.0 + jax.lax.erf(y / jnp.sqrt(2.0)))


if __name__ == "__main__":
    # Small config consistent with BertIntermediate: hidden_size=32, intermediate_size=128.
    B, S, H, N = 2, 8, 32, 128

    key = jax.random.PRNGKey(0)
    kx, kw, kb = jax.random.split(key, 3)

    hidden_states = jax.random.normal(kx, (B, S, H), dtype=jnp.float32)
    # nn.Linear(hidden_size, intermediate_size): weight [N, H], bias [N]
    weight = jax.random.normal(kw, (N, H), dtype=jnp.float32) * 0.02
    bias = jax.random.normal(kb, (N,), dtype=jnp.float32) * 0.02
    weight_t = weight.T  # [H, N]

    ref = _reference(hidden_states, weight_t, bias)

    # Fast path: bf16 MXU inputs, f32 accumulation + epilogue (relaxed tolerance).
    out_bf16 = bert_intermediate(hidden_states, weight_t, bias)
    out_bf16 = jax.block_until_ready(out_bf16)
    assert out_bf16.shape == (B, S, N)
    assert jnp.allclose(out_bf16, ref, atol=2e-2, rtol=2e-2)

    # Exact-semantics path: full f32, matches the PyTorch module to tight tolerance.
    out_f32 = bert_intermediate(hidden_states, weight_t, bias,
                                compute_dtype=jnp.float32)
    out_f32 = jax.block_until_ready(out_f32)
    assert out_f32.shape == (B, S, N)
    assert jnp.allclose(out_f32, ref, atol=1e-5, rtol=1e-5)

    print("KERNEL_OK")
</pallas_src>

<mosaic_0001>
module attributes {stable_mosaic.version = 11 : i64} {
  func.func @_intermediate_kernel(%arg0: i32, %arg1: i32, %arg2: memref<16x32xbf16, #tpu.memory_space<vmem>>, %arg3: memref<32x128xbf16, #tpu.memory_space<vmem>>, %arg4: memref<1x128xf32, #tpu.memory_space<vmem>>, %arg5: memref<16x128xf32, #tpu.memory_space<vmem>>) attributes {dimension_semantics = [#tpu.dimension_semantics<parallel>, #tpu.dimension_semantics<parallel>], iteration_bounds = array<i64: 1, 1>, scalar_prefetch = 0 : i64, scratch_operands = 0 : i64, tpu.core_type = #tpu.core_type<tc>, window_params = [{transform_indices = @transform_0, window_bounds = array<i64: 16, 32>}, {transform_indices = @transform_1, window_bounds = array<i64: 32, 128>}, {transform_indices = @transform_2, window_bounds = array<i64: 1, 128>}, {transform_indices = @transform_3, window_bounds = array<i64: 16, 128>}]} {
    %c0 = arith.constant 0 : index
    %c0_0 = arith.constant 0 : index
    %0 = vector.load %arg2[%c0, %c0_0] : memref<16x32xbf16, #tpu.memory_space<vmem>>, vector<16x32xbf16>
    %c0_1 = arith.constant 0 : index
    %c0_2 = arith.constant 0 : index
    %1 = vector.load %arg3[%c0_1, %c0_2] : memref<32x128xbf16, #tpu.memory_space<vmem>>, vector<32x128xbf16>
    %cst = arith.constant dense<0.000000e+00> : vector<16x128xf32>
    %2 = tpu.matmul %0, %1, %cst {dimension_numbers = #tpu.dot_dimension_numbers<[1], [0], [0], [1], [0, 0, 1, 1], [], []>} : vector<16x32xbf16>, vector<32x128xbf16>, vector<16x128xf32> -> vector<16x128xf32>
    %c0_3 = arith.constant 0 : index
    %c0_4 = arith.constant 0 : index
    %3 = vector.load %arg4[%c0_3, %c0_4] : memref<1x128xf32, #tpu.memory_space<vmem>>, vector<1x128xf32>
    %4 = vector.broadcast %3 : vector<1x128xf32> to vector<16x128xf32>
    %5 = arith.addf %2, %4 : vector<16x128xf32>
    %cst_5 = arith.constant 5.000000e-01 : f32
    %6 = vector.broadcast %cst_5 : f32 to vector<16x128xf32>
    %7 = arith.mulf %5, %6 : vector<16x128xf32>
    %cst_6 = arith.constant 0.707106769 : f32
    %8 = vector.broadcast %cst_6 : f32 to vector<16x128xf32>
    %9 = arith.mulf %5, %8 : vector<16x128xf32>
    %10 = math.erf %9 : vector<16x128xf32>
    %cst_7 = arith.constant 1.000000e+00 : f32
    %11 = vector.broadcast %cst_7 : f32 to vector<16x128xf32>
    %12 = arith.addf %11, %10 : vector<16x128xf32>
    %13 = arith.mulf %7, %12 : vector<16x128xf32>
    %c0_8 = arith.constant 0 : index
    %c0_9 = arith.constant 0 : index
    %14 = vector.load %arg5[%c0_8, %c0_9] : memref<16x128xf32, #tpu.memory_space<vmem>>, vector<16x128xf32>
    tpu.vector_store %arg5[%c0_8, %c0_9], %13 {strides = array<i32>} : memref<16x128xf32, #tpu.memory_space<vmem>>, vector<16x128xf32>,
    return
  }
  func.func @transform_0(%arg0: i32, %arg1: i32) -> (i32, i32) {
    %c0_i32 = arith.constant 0 : i32
    %c0_i32_0 = arith.constant 0 : i32
    return %arg1, %c0_i32 : i32, i32
  }
  func.func @transform_1(%arg0: i32, %arg1: i32) -> (i32, i32) {
    %c0_i32 = arith.constant 0 : i32
    %c0_i32_0 = arith.constant 0 : i32
    return %c0_i32, %arg0 : i32, i32
  }
  func.func @transform_2(%arg0: i32, %arg1: i32) -> (i32, i32) {
    %c0_i32 = arith.constant 0 : i32
    %c0_i32_0 = arith.constant 0 : i32
    return %c0_i32, %arg0 : i32, i32
  }
  func.func @transform_3(%arg0: i32, %arg1: i32) -> (i32, i32) {
    %c0_i32 = arith.constant 0 : i32
    return %arg1, %arg0 : i32, i32
  }
}

</mosaic_0001>

<bundles_post_ra>
// kernel: tpu_custom_call.1
= control target key start
LH: loop header
LB: loop body
LE: loop exit
PB: predicated region body
PF: predicated region fallthrough
CT: control target
= control target key end

     0   :  { %8 = vsyncpa [#allocation3], 0  ;;  %s372_s0 = inlined_call_operand.hbm [shape: bf16[16,32], index: 0, kind: input, shape index: {}]   ;;  %s373_s1 = inlined_call_operand.hbm [shape: bf16[32,128], index: 1, kind: input, shape index: {}]   ;;  %s374_s2 = inlined_call_operand.hbm [shape: f32[1,128], index: 2, kind: input, shape index: {}]   ;;  %s375_s3 = inlined_call_operand.hbm [shape: f32[16,128], index: 3, kind: output, shape index: {}]  }
   0x1   :  { %9 = vsyncpa [#allocation6], 0 }
   0x2   :  { %10 = vsyncpa [#allocation4], 0  ;;  %s287_s12 = smov [#allocation5]   ;;  %s288_s14 = smov [#allocation2]  }
   0x3   :  { %s28_s13 = sshll.u32 %s287_s12, 4  ;;  %s16_s15 = sshll.u32 %s288_s14, 4  ;;  %s29_s13 = int_to_ptr.vmem [resolvable:$true] %s28_s13  ;;  %s317_s15 = int_to_ptr.vmem [resolvable:$true] %s16_s15 }
   0x4   :  { %s193_s18 = scalar_lea.hbm %s373_s1, 256 }
   0x5   :  { %p194_p0 = scmp.ne.s32.totalorder %s373_s1, %s193_s18  ;;  %p197_p1 = scmp.lt.u32.totalorder %s193_s18, %s373_s1 }
   0x7   :  { %p199_p2 = pnand %p197_p1, %p194_p0 }
   0x9   :  { %202 = shalt.err (!%p199_p2)
}
   0xa   :  { %s203_s23 = scalar_lea.vmem %s29_s13, 256  ;;  %p208_p4 = scmp.lt.s32.totalorder %s29_s13, %s29_s13 }
   0xb   :  { %p204_p3 = scmp.ne.s32.totalorder %s29_s13, %s203_s23  ;;  %p209_p5 = scmp.lt.s32.totalorder %s203_s23, %s203_s23 }
   0xd   :  { %p210_p6 = por %p209_p5, %p208_p4 }
   0xf   :  { %p211_p7 = pnand %p210_p6, %p204_p3 }
  0x11   :  { %214 = shalt.err (!%p211_p7)
}
  0x12   :  { %s289_s24 = smov 64   ;;  %s290_s25 = smov 4  }
  0x13   :  { %34 = dma.hbm_to_vmem [thread:$0]  %s373_s1, 256, %s29_s13, [#allocation6], %s289_s24, %s289_s24, %s290_s25  }
  0x14   :  { %s215_s30 = scalar_lea.hbm %s372_s0, 128 }
  0x15   :  { %p216_p8 = scmp.ne.s32.totalorder %s372_s0, %s215_s30  ;;  %p219_p9 = scmp.lt.u32.totalorder %s215_s30, %s372_s0 }
  0x17   :  { %p221_p10 = pnand %p219_p9, %p216_p8 }
  0x19   :  { %224 = shalt.err (!%p221_p10)
}
  0x1a   :  { %s225_s8 = scalar_lea.vmem %s317_s15, 128  ;;  %p230_p12 = scmp.lt.s32.totalorder %s317_s15, %s317_s15 }
  0x1b   :  { %p226_p11 = scmp.ne.s32.totalorder %s317_s15, %s225_s8  ;;  %p231_p13 = scmp.lt.s32.totalorder %s225_s8, %s225_s8 }
  0x1d   :  { %p232_p0 = por %p231_p13, %p230_p12 }
  0x1f   :  { %p233_p1 = pnand %p232_p0, %p226_p11 }
  0x21   :  { %236 = shalt.err (!%p233_p1)
}
  0x22   :  { %22 = dma.hbm_to_vmem [thread:$0]  %s372_s0, 128, %s317_s15, [#allocation3], %s289_s24, %s289_s24, %s290_s25  }
  0x23   :  { %s291_s10 = smov [#allocation7]   ;;  %s237_s14 = scalar_lea.hbm %s374_s2, 16 }
  0x24   :  { %s41_s11 = sshll.u32 %s291_s10, 4  ;;  %p238_p2 = scmp.ne.s32.totalorder %s374_s2, %s237_s14  ;;  %s42_s11 = int_to_ptr.vmem [resolvable:$true] %s41_s11 }
  0x25   :  { %p241_p3 = scmp.lt.u32.totalorder %s237_s14, %s374_s2 }
  0x27   :  { %p243_p4 = pnand %p241_p3, %p238_p2 }
  0x29   :  { %246 = shalt.err (!%p243_p4)
}
  0x2a   :  { %s247_s20 = scalar_lea.vmem %s42_s11, 16  ;;  %s251_s0 = scalar_lea.vmem %s42_s11, 32 }
  0x2b   :  { %p248_p5 = scmp.ne.s32.totalorder %s42_s11, %s247_s20  ;;  %p252_p6 = scmp.lt.s32.totalorder %s42_s11, %s42_s11 }
  0x2c   :  { %p253_p7 = scmp.lt.s32.totalorder %s251_s0, %s247_s20 }
  0x2e   :  { %p254_p8 = por %p253_p7, %p252_p6 }
  0x30   :  { %p255_p9 = pnand %p254_p8, %p248_p5 }
  0x32   :  { %258 = shalt.err (!%p255_p9)
}
  0x33   :  { %44 = dma.hbm_to_vmem [thread:$0]  %s374_s2, 16, %s42_s11, [#allocation6]  }
  0x34   :  { %281 = dma.done.wait [#allocation3], 128  }
  0x35   :  { %282 = vsyncadd [#allocation3], 4294967168 }
  0x36   :  { %283 = dma.done.wait [#allocation6], 272  }
  0x37   :  { %284 = vsyncadd [#allocation6], 4294967024  ;;  %v292_v0 = vmov 0.0   ;;  %vm293_vm0 = vmmov 0   ;;  %v186_v1 = vld [vmem:[#allocation5] sm:$0xff]   ;;  %v187_v2 = vld [vmem:[#allocation5 + $0x8] sm:$0xff]  }
  0x38   :  { %168 = vmatprep.subr.bf16.mxu0 %v292_v0  ;;  %172 = vmatprep.mubr.msk.bf16.mxu0 %vm293_vm0, %v292_v0  ;;  %v188_v3 = vld [vmem:[#allocation2] sm:$0xff]   ;;  %vm85_vm1 = vcmask 261120   ;;  %v160_v4 = vld [vmem:[#allocation7] ss:$0 sm:$0xff]  ;;  %s294_s2 = smov [#allocation8]  }
  0x39   :  { %169 = vmatpush3.bf16.msra.mxu0 %v186_v1  ;;  %s147_s22 = sshll.u32 %s294_s2, 4  ;;  %s148_s22 = int_to_ptr.vmem [resolvable:$true] %s147_s22 }
  0x3a   :  { %170 = vmatprep.subr.bf16.mxu0 %v292_v0  ;;  %s259_s23 = scalar_lea.vmem %s148_s22, 256  ;;  %p264_p11 = scmp.lt.s32.totalorder %s148_s22, %s148_s22 }
  0x3b   :  { %p260_p10 = scmp.ne.s32.totalorder %s148_s22, %s259_s23  ;;  %p265_p12 = scmp.lt.s32.totalorder %s259_s23, %s259_s23 }
  0x3d   :  { %171 = vmatpush3.bf16.msra.mxu0 %v187_v2  ;;  %p266_p13 = por %p265_p12, %p264_p11 }
  0x3f   :  { %p267_p0 = pnand %p266_p13, %p260_p10 }
  0x40   :  { %173 = vmatmul.mubr.msk.bf16.vlgmr.msra.gmra.mrb[0].mxu0 %vm85_vm1, %v188_v3 }
 0x113   :  { %v123_v5 = vpop.f32.mrb[0].mxu0 }
 0x114   :  { %v124_v6 = vadd.f32 %v160_v4, %v123_v5  ;;  %v174_v7 = vpop.f32.mrb[1].mxu0 }
 0x115   :  { %v126_v8 = vpop.f32.mrb[2].mxu0 }
 0x116   :  { %v132_v9 = vmul.f32 0.70710677, %v124_v6  ;;  %v127_v10 = vadd.f32 %v160_v4, %v126_v8  ;;  %v175_v11 = vpop.f32.mrb[3].mxu0  ;;  %v130_v14 = vmul.f32 0.5, %v124_v6 }
 0x118   :  { %189 = verf.f32 %v132_v9  ;;  %v133_v12 = vmul.f32 0.70710677, %v127_v10  ;;  %v131_v18 = vmul.f32 0.5, %v127_v10 }
 0x11a   :  { %191 = verf.f32 %v133_v12 }
 0x122   :  { %v190_v13 = vpop.eup %189 }
 0x123   :  { %v136_v15 = vadd.f32 1.0, %v190_v13 }
 0x124   :  { %v192_v16 = vpop.eup %191 }
 0x125   :  { %v138_v17 = vmul.f32 %v136_v15, %v130_v14  ;;  %v137_v19 = vadd.f32 1.0, %v192_v16 }
 0x127   :  { %140 = vst [vmem:[#allocation8] sm:$0xff] %v138_v17  ;;  %v139_v20 = vmul.f32 %v137_v19, %v131_v18 }
 0x129   :  { %141 = vst [vmem:[#allocation8 + $0x8] sm:$0xff] %v139_v20 }
 0x12a   :  { %270 = shalt.err (!%p267_p0)
}
 0x12b   :  { %s271_s26 = scalar_lea.hbm %s375_s3, 256 }
 0x12c   :  { %p272_p1 = scmp.ne.s32.totalorder %s375_s3, %s271_s26  ;;  %p275_p2 = scmp.lt.u32.totalorder %s271_s26, %s375_s3 }
 0x12e   :  { %p277_p3 = pnand %p275_p2, %p272_p1 }
 0x130   :  { %280 = shalt.err (!%p277_p3)
}
 0x131   :  { %s295_s4 = smov 128   ;;  %s296_s5 = smov 8  }
 0x132   :  { %153 = dma.vmem_to_hbm [thread:$0]  %s148_s22, 256, %s375_s3, [#allocation4], %s295_s4, %s295_s4, %s296_s5  }
 0x133   :  { %285 = dma.done.wait [#allocation4], 256  }
 0x134   :  { %286 = vsyncadd [#allocation4], 4294967040 }
 0x135   :  { %157 = vsyncpa [#allocation3], 1 }
 0x136   :  { %158 = vsyncpa [#allocation6], 1 }
 0x137   :  { %159 = vsyncpa [#allocation4], 1 }

</bundles_post_ra>
